<compile_context>
chip_gen: v6e
topology: v6e:2x2x1
jax: 0.10.0
libtpu: 0.0.40
codegen_flags: <defaults>
</compile_context>

<pallas_src>
import functools

import jax
import jax.numpy as jnp
from jax import lax
from jax.experimental import pallas as pl
from jax.experimental.pallas import tpu as pltpu


def _round_up(v, m):
    return (v + m - 1) // m * m


def _content_extractor_kernel(x_ref, refn_ref, refw_ref, b_ref, out_ref, *,
                              n_valid, k):
    # x_ref    : (1, D_pad, tT)     bf16  raw (un-normalized) source features
    # refn_ref : (1, N_pad, D_pad)  bf16  row-normalized LUT
    # refw_ref : (1, C_pad, N_pad)  bf16  W @ ref^T (projection of raw LUT rows)
    # b_ref    : (C_pad, 1)         f32   conv bias
    # out_ref  : (1, C_pad, tT)
    x = x_ref[0]                      # (D_pad, tT)
    ref_n = refn_ref[0]               # (N_pad, D_pad)

    # Cosine similarities up to a positive per-column scale (src norm dropped --
    # it cannot change the per-column top-k ranking).  bf16 MXU, f32 accum.
    s = jnp.dot(ref_n, x, preferred_element_type=jnp.float32)      # (N_pad, tT)

    n_pad = s.shape[0]
    if n_valid < n_pad:
        # LUT padding rows must never be selected.
        row = lax.broadcasted_iota(jnp.int32, s.shape, 0)
        s = jnp.where(row < n_valid, s, -jnp.inf)

    # Iterative top-k as a {0,1} selection matrix.  One sublane max-reduce per
    # step; on an exact fp tie all tied entries are taken in that step
    # (torch.topk's tie order is unspecified anyway).  Requires k <= n_valid.
    sel = jnp.zeros(s.shape, jnp.float32)
    for _ in range(k):
        m = jnp.max(s, axis=0, keepdims=True)                      # (1, tT)
        hit = s == m                                               # (N_pad, tT)
        sel = sel + hit.astype(jnp.float32)
        s = jnp.where(hit, -jnp.inf, s)

    # gather + mean + 1x1 conv fused:  out = (W @ ref^T) @ sel / k + b
    out = jnp.dot(refw_ref[0], sel.astype(jnp.bfloat16),
                  preferred_element_type=jnp.float32)               # (C_pad, tT)
    out_ref[0] = (out * (1.0 / k) + b_ref[...]).astype(out_ref.dtype)


def _prep_lut(lut, w):
    """Once-per-parameter preprocessing (wrapper side, shared with the reference)."""
    f32 = jnp.float32
    ref = jnp.transpose(lut, (0, 2, 1)).astype(f32)                 # (B, N, D)
    ref_n = ref * lax.rsqrt(jnp.sum(ref * ref, axis=-1, keepdims=True))
    refw = jnp.einsum("cd,bnd->bcn", w.astype(f32), ref)            # (B, C, N)
    return ref, ref_n.astype(jnp.bfloat16), refw


def content_extractor_forward(x, lut, w, b, *, k=4, tile_t=None):
    """x: (B, D, T), lut: (B, D, N), w: (C, D), b: (C,)  ->  (B, C, T)."""
    B, D, T = x.shape
    N = lut.shape[2]
    C = w.shape[0]
    assert k <= N, "top-k requires k <= number of LUT entries"

    # Pad to vreg/MXU-friendly shapes (zero padding is exact; padded LUT rows
    # are masked out of the ranking inside the kernel).
    D_pad = _round_up(D, 128)        # contraction dim (lane dim of ref_n)
    N_pad = _round_up(N, 128)        # lane dim of refW / sublane dim of sims
    C_pad = _round_up(C, 8)          # sublane dim of the output block

    if tile_t is None:
        # 256 = MXU-M multiple on v6e/v7x; small T uses a single full-T block.
        tile_t = 256 if T >= 256 else _round_up(T, 8)
    tT = tile_t
    T_pad = _round_up(T, tT)
    assert tT % 128 == 0 or tT == T_pad, "T tile must be lane-aligned or cover T"

    _, refn_b, refw = _prep_lut(lut, w)

    bf16 = jnp.bfloat16
    x_p = jnp.zeros((B, D_pad, T_pad), bf16).at[:, :D, :T].set(x.astype(bf16))
    refn_p = jnp.zeros((B, N_pad, D_pad), bf16).at[:, :N, :D].set(refn_b)
    refw_p = jnp.zeros((B, C_pad, N_pad), bf16).at[:, :C, :N].set(refw.astype(bf16))
    b_p = jnp.zeros((C_pad, 1), jnp.float32).at[:C, 0].set(b.astype(jnp.float32))

    grid = (B, T_pad // tT)
    out = pl.pallas_call(
        functools.partial(_content_extractor_kernel, n_valid=N, k=k),
        out_shape=jax.ShapeDtypeStruct((B, C_pad, T_pad), x.dtype),
        grid_spec=pltpu.PrefetchScalarGridSpec(
            num_scalar_prefetch=0,
            grid=grid,
            in_specs=[
                # activation: tiled over (batch, time)
                pl.BlockSpec((1, D_pad, tT), lambda bi, ti: (bi, 0, ti)),
                # LUT-side operands: constant across the T axis -> stay resident
                pl.BlockSpec((1, N_pad, D_pad), lambda bi, ti: (bi, 0, 0)),
                pl.BlockSpec((1, C_pad, N_pad), lambda bi, ti: (bi, 0, 0)),
                pl.BlockSpec((C_pad, 1), lambda bi, ti: (0, 0)),
            ],
            out_specs=pl.BlockSpec((1, C_pad, tT), lambda bi, ti: (bi, 0, ti)),
        ),
        compiler_params=pltpu.CompilerParams(
            dimension_semantics=("parallel", "parallel"),
            # above the 16/32 MiB scoped defaults, below v7x's 64 MiB physical
            vmem_limit_bytes=48 * 1024 * 1024,
        ),
    )(x_p, refn_p, refw_p, b_p)

    return out[:, :C, :T]


def _reference_forward(x, lut, w, b, *, k=4):
    """Plain-JAX mirror of the PyTorch module used for the self-check.

    The similarity operands are rounded to bf16 exactly as the kernel feeds the
    MXU, so the top-k *selection* is deterministic and identical to the
    kernel's (dropping the source norm is ranking-neutral: it is a positive
    per-row scale).  Gather / mean / projection are computed in f32.
    """
    f32 = jnp.float32
    ref, refn_b, _ = _prep_lut(lut, w)                              # (B, N, D)
    x_b = x.astype(jnp.bfloat16).astype(f32)                        # (B, D, T)
    sims = jnp.einsum("bdt,bnd->btn", x_b, refn_b.astype(f32),
                      precision=lax.Precision.HIGHEST)              # (B, T, N)
    _, idx = lax.top_k(sims, k)                                     # (B, T, k)
    gathered = jnp.take_along_axis(ref[:, None, :, :], idx[..., None], axis=2)
    feats = gathered.mean(axis=2)                                   # (B, T, D)
    out = jnp.einsum("btd,cd->btc", feats, w.astype(f32)) + b[None, None, :].astype(f32)
    return jnp.transpose(out, (0, 2, 1)).astype(x.dtype)            # (B, C, T)


if __name__ == "__main__":
    # Small shapes consistent with the module (hubert_dim / internal_channels
    # passed explicitly to the constructor).
    B, D, T = 2, 32, 8       # batch, hubert_dim, sequence length
    N = 16                   # number of LUT entries
    C = 16                   # internal_channels
    K = 4

    key = jax.random.PRNGKey(0)
    kx, klut, kw, kb, kx2 = jax.random.split(key, 5)

    x = jax.random.normal(kx, (B, D, T), dtype=jnp.float32)
    lut = jax.random.normal(klut, (B, D, N), dtype=jnp.float32)      # nn.Parameter(lut)
    w = jax.random.normal(kw, (C, D), dtype=jnp.float32) * 0.05      # Conv1d weight (C,D,1) squeezed
    b = jax.random.normal(kb, (C,), dtype=jnp.float32) * 0.05        # Conv1d bias

    out = jax.block_until_ready(content_extractor_forward(x, lut, w, b, k=K))
    ref_out = _reference_forward(x, lut, w, b, k=K)
    assert out.shape == (B, C, T)
    assert jnp.allclose(out, ref_out, atol=1e-2, rtol=1e-2), "mismatch vs reference"

    # Second config: exercises the T-tiled grid (two lane-dense 128-wide tiles).
    T2 = 256
    x2 = jax.random.normal(kx2, (1, D, T2), dtype=jnp.float32)
    lut2 = lut[:1]
    out2 = jax.block_until_ready(
        content_extractor_forward(x2, lut2, w, b, k=K, tile_t=128))
    ref_out2 = _reference_forward(x2, lut2, w, b, k=K)
    assert out2.shape == (1, C, T2)
    assert jnp.allclose(out2, ref_out2, atol=1e-2, rtol=1e-2), "mismatch vs reference (tiled)"

    print("KERNEL_OK")
</pallas_src>

<mosaic_0001>
module attributes {stable_mosaic.version = 11 : i64} {
  func.func @_content_extractor_kernel(%arg0: i32, %arg1: i32, %arg2: memref<1x128x8xbf16, #tpu.memory_space<vmem>>, %arg3: memref<1x128x128xbf16, #tpu.memory_space<vmem>>, %arg4: memref<1x16x128xbf16, #tpu.memory_space<vmem>>, %arg5: memref<16x1xf32, #tpu.memory_space<vmem>>, %arg6: memref<1x16x8xf32, #tpu.memory_space<vmem>>) attributes {dimension_semantics = [#tpu.dimension_semantics<parallel>, #tpu.dimension_semantics<parallel>], iteration_bounds = array<i64: 2, 1>, scalar_prefetch = 0 : i64, scratch_operands = 0 : i64, tpu.core_type = #tpu.core_type<tc>, window_params = [{transform_indices = @transform_0, window_bounds = array<i64: 1, 128, 8>}, {transform_indices = @transform_1, window_bounds = array<i64: 1, 128, 128>}, {transform_indices = @transform_2, window_bounds = array<i64: 1, 16, 128>}, {pipeline_mode = #tpu.pipeline_mode<synchronous>, transform_indices = @transform_3, window_bounds = array<i64: 16, 1>}, {transform_indices = @transform_4, window_bounds = array<i64: 1, 16, 8>}]} {
    %c0 = arith.constant 0 : index
    %c0_0 = arith.constant 0 : index
    %c0_1 = arith.constant 0 : index
    %0 = vector.load %arg2[%c0, %c0_0, %c0_1] : memref<1x128x8xbf16, #tpu.memory_space<vmem>>, vector<1x128x8xbf16>
    %1 = vector.shape_cast %0 : vector<1x128x8xbf16> to vector<128x8xbf16>
    %c0_2 = arith.constant 0 : index
    %c0_3 = arith.constant 0 : index
    %c0_4 = arith.constant 0 : index
    %2 = vector.load %arg3[%c0_2, %c0_3, %c0_4] : memref<1x128x128xbf16, #tpu.memory_space<vmem>>, vector<1x128x128xbf16>
    %3 = vector.shape_cast %2 : vector<1x128x128xbf16> to vector<128x128xbf16>
    %cst = arith.constant dense<0.000000e+00> : vector<128x8xf32>
    %4 = tpu.matmul %3, %1, %cst {dimension_numbers = #tpu.dot_dimension_numbers<[1], [0], [0], [1], [0, 0, 1, 1], [], []>} : vector<128x128xbf16>, vector<128x8xbf16>, vector<128x8xf32> -> vector<128x8xf32>
    %5 = tpu.iota {dimensions = array<i32: 0>} : vector<128x8xi32>
    %c16_i32 = arith.constant 16 : i32
    %6 = vector.broadcast %c16_i32 : i32 to vector<128x8xi32>
    %7 = arith.cmpi slt, %5, %6 : vector<128x8xi32>
    %cst_5 = arith.constant 0xFF800000 : f32
    %8 = vector.broadcast %cst_5 : f32 to vector<128x8xf32>
    %9 = arith.select %7, %4, %8 : vector<128x8xi1>, vector<128x8xf32>
    %cst_6 = arith.constant 0.000000e+00 : f32
    %10 = vector.broadcast %cst_6 : f32 to vector<128x8xf32>
    %cst_7 = arith.constant dense<0xFF800000> : vector<8xf32>
    %11 = vector.multi_reduction <maximumf>, %9, %cst_7 [0] : vector<128x8xf32> to vector<8xf32>
    %12 = vector.shape_cast %11 : vector<8xf32> to vector<1x8xf32>
    %13 = vector.broadcast %12 : vector<1x8xf32> to vector<128x8xf32>
    %14 = arith.cmpf oeq, %9, %13 : vector<128x8xf32>
    %15 = arith.extui %14 : vector<128x8xi1> to vector<128x8xi32>
    %16 = arith.sitofp %15 : vector<128x8xi32> to vector<128x8xf32>
    %17 = arith.addf %10, %16 : vector<128x8xf32>
    %cst_8 = arith.constant 0xFF800000 : f32
    %18 = vector.broadcast %cst_8 : f32 to vector<128x8xf32>
    %19 = arith.select %14, %18, %9 : vector<128x8xi1>, vector<128x8xf32>
    %cst_9 = arith.constant dense<0xFF800000> : vector<8xf32>
    %20 = vector.multi_reduction <maximumf>, %19, %cst_9 [0] : vector<128x8xf32> to vector<8xf32>
    %21 = vector.shape_cast %20 : vector<8xf32> to vector<1x8xf32>
    %22 = vector.broadcast %21 : vector<1x8xf32> to vector<128x8xf32>
    %23 = arith.cmpf oeq, %19, %22 : vector<128x8xf32>
    %24 = arith.extui %23 : vector<128x8xi1> to vector<128x8xi32>
    %25 = arith.sitofp %24 : vector<128x8xi32> to vector<128x8xf32>
    %26 = arith.addf %17, %25 : vector<128x8xf32>
    %cst_10 = arith.constant 0xFF800000 : f32
    %27 = vector.broadcast %cst_10 : f32 to vector<128x8xf32>
    %28 = arith.select %23, %27, %19 : vector<128x8xi1>, vector<128x8xf32>
    %cst_11 = arith.constant dense<0xFF800000> : vector<8xf32>
    %29 = vector.multi_reduction <maximumf>, %28, %cst_11 [0] : vector<128x8xf32> to vector<8xf32>
    %30 = vector.shape_cast %29 : vector<8xf32> to vector<1x8xf32>
    %31 = vector.broadcast %30 : vector<1x8xf32> to vector<128x8xf32>
    %32 = arith.cmpf oeq, %28, %31 : vector<128x8xf32>
    %33 = arith.extui %32 : vector<128x8xi1> to vector<128x8xi32>
    %34 = arith.sitofp %33 : vector<128x8xi32> to vector<128x8xf32>
    %35 = arith.addf %26, %34 : vector<128x8xf32>
    %cst_12 = arith.constant 0xFF800000 : f32
    %36 = vector.broadcast %cst_12 : f32 to vector<128x8xf32>
    %37 = arith.select %32, %36, %28 : vector<128x8xi1>, vector<128x8xf32>
    %cst_13 = arith.constant dense<0xFF800000> : vector<8xf32>
    %38 = vector.multi_reduction <maximumf>, %37, %cst_13 [0] : vector<128x8xf32> to vector<8xf32>
    %39 = vector.shape_cast %38 : vector<8xf32> to vector<1x8xf32>
    %40 = vector.broadcast %39 : vector<1x8xf32> to vector<128x8xf32>
    %41 = arith.cmpf oeq, %37, %40 : vector<128x8xf32>
    %42 = arith.extui %41 : vector<128x8xi1> to vector<128x8xi32>
    %43 = arith.sitofp %42 : vector<128x8xi32> to vector<128x8xf32>
    %44 = arith.addf %35, %43 : vector<128x8xf32>
    %c0_14 = arith.constant 0 : index
    %c0_15 = arith.constant 0 : index
    %c0_16 = arith.constant 0 : index
    %45 = vector.load %arg4[%c0_14, %c0_15, %c0_16] : memref<1x16x128xbf16, #tpu.memory_space<vmem>>, vector<1x16x128xbf16>
    %46 = vector.shape_cast %45 : vector<1x16x128xbf16> to vector<16x128xbf16>
    %47 = arith.truncf %44 : vector<128x8xf32> to vector<128x8xbf16>
    %cst_17 = arith.constant dense<0.000000e+00> : vector<16x8xf32>
    %48 = tpu.matmul %46, %47, %cst_17 {dimension_numbers = #tpu.dot_dimension_numbers<[1], [0], [0], [1], [0, 0, 1, 1], [], []>} : vector<16x128xbf16>, vector<128x8xbf16>, vector<16x8xf32> -> vector<16x8xf32>
    %cst_18 = arith.constant 2.500000e-01 : f32
    %49 = vector.broadcast %cst_18 : f32 to vector<16x8xf32>
    %50 = arith.mulf %48, %49 : vector<16x8xf32>
    %c0_19 = arith.constant 0 : index
    %c0_20 = arith.constant 0 : index
    %51 = vector.load %arg5[%c0_19, %c0_20] : memref<16x1xf32, #tpu.memory_space<vmem>>, vector<16x1xf32>
    %52 = vector.broadcast %51 : vector<16x1xf32> to vector<16x8xf32>
    %53 = arith.addf %50, %52 : vector<16x8xf32>
    %c0_21 = arith.constant 0 : index
    %c0_22 = arith.constant 0 : index
    %c0_23 = arith.constant 0 : index
    %54 = vector.load %arg6[%c0_21, %c0_22, %c0_23] : memref<1x16x8xf32, #tpu.memory_space<vmem>>, vector<1x16x8xf32>
    %55 = vector.shape_cast %54 : vector<1x16x8xf32> to vector<16x8xf32>
    %56 = vector.shape_cast %53 : vector<16x8xf32> to vector<1x16x8xf32>
    tpu.vector_store %arg6[%c0_21, %c0_22, %c0_23], %56 {strides = array<i32>} : memref<1x16x8xf32, #tpu.memory_space<vmem>>, vector<1x16x8xf32>,
    return
  }
  func.func @transform_0(%arg0: i32, %arg1: i32) -> (i32, i32, i32) {
    %c0_i32 = arith.constant 0 : i32
    %c0_i32_0 = arith.constant 0 : i32
    return %arg0, %c0_i32, %arg1 : i32, i32, i32
  }
  func.func @transform_1(%arg0: i32, %arg1: i32) -> (i32, i32, i32) {
    %c0_i32 = arith.constant 0 : i32
    %c0_i32_0 = arith.constant 0 : i32
    %c0_i32_1 = arith.constant 0 : i32
    return %arg0, %c0_i32, %c0_i32_0 : i32, i32, i32
  }
  func.func @transform_2(%arg0: i32, %arg1: i32) -> (i32, i32, i32) {
    %c0_i32 = arith.constant 0 : i32
    %c0_i32_0 = arith.constant 0 : i32
    %c0_i32_1 = arith.constant 0 : i32
    return %arg0, %c0_i32, %c0_i32_0 : i32, i32, i32
  }
  func.func @transform_3(%arg0: i32, %arg1: i32) -> (i32, i32) {
    %c0_i32 = arith.constant 0 : i32
    %c0_i32_0 = arith.constant 0 : i32
    %c0_i32_1 = arith.constant 0 : i32
    return %c0_i32, %c0_i32_0 : i32, i32
  }
  func.func @transform_4(%arg0: i32, %arg1: i32) -> (i32, i32, i32) {
    %c0_i32 = arith.constant 0 : i32
    %c0_i32_0 = arith.constant 0 : i32
    return %arg0, %c0_i32, %arg1 : i32, i32, i32
  }
}

</mosaic_0001>

<bundles_post_ra>
// kernel: tpu_custom_call.1
= control target key start
LH: loop header
LB: loop body
LE: loop exit
PB: predicated region body
PF: predicated region fallthrough
CT: control target
= control target key end

     0   :  { %s1509_s15 = smov 0   ;;  %s1511_s16 = smov 0   ;;  %s1622_s0 = inlined_call_operand.vmem [shape: bf16[2,128,8], index: 0, kind: input, shape index: {}]   ;;  %s1623_s1 = inlined_call_operand.vmem [shape: bf16[2,128,128], index: 1, kind: input, shape index: {}]   ;;  %s1624_s2 = inlined_call_operand.vmem [shape: bf16[2,16,128], index: 2, kind: input, shape index: {}]   ;;  %s1625_s3 = inlined_call_operand.vmem [shape: f32[16,1], index: 3, kind: input, shape index: {}]   ;;  %s1626_s4 = inlined_call_operand.vmem [shape: f32[2,16,8], index: 4, kind: output, shape index: {}]  }
   0x1   :  { %s1513_s17 = smov 0  }
   0x2 LB: > { %s26_s18 = sadd.s32 1, %s1475_s16  ;;  %p1183_p0 = scmp.ge.s32.totalorder %s1479_s17, 1  ;;  %s1479_s17 = sphi %s1513_s17, %s14_s17   ;;  %s1475_s16 = sphi %s1511_s16, %s1628_s16   ;;  %s1471_s15 = sphi %s1509_s15, %s1627_s15  }
   0x3   : > { %p28_p1 = scmp.ge.s32.totalorder %s26_s18, 2  ;;  %p201_p2 = scmp.lt.s32.totalorder %s1479_s17, 3 }
   0x5   : > { %s1630_s18 = smov (%p28_p1, %s26_s18), 0  ;;  %p202_p3 = pnand %p1183_p0, %p201_p2 }
   0x6   : > { %p243_p4 = scmp.lt.s32.totalorder (!%p202_p3), %s1471_s15, 1 }
   0x7   : > { %205 = sbr.rel (%p202_p3) target bundleno = 552 (0x228), region = 36 }
   0xc   : > { %s1632_s15 = smov (!%p243_p4, %s1471_s15), 1  ;;  %v1481_v10 = vmov 0.0   ;;  %vm1482_vm0 = vmmov 0   ;;  %v1056_v17 = vld [vmem:[%s1625_s3] sm:$0xff]  ;;  %v1483_v18 = vmov 0   ;;  %v1057_v19 = vld [vmem:[%s1625_s3 + $0x8] sm:$0xff] }
   0xd   : > { %s1331_s19 = sshll.u32 %s1632_s15, 6  ;;  %1392 = vmatprep.subr.bf16.mxu1 %v1481_v10  ;;  %s1333_s26 = sshll.u32 %s1632_s15, 3  ;;  %1408 = vmatprep.mubr.msk.bf16.mxu1 %vm1482_vm0, %v1481_v10  ;;  %vm544_vm1 = vcmask 64512  }
   0xe   : > { %s250_s22 = scalar_lea.vmem %s1622_s0, %s1331_s19  ;;  %s1536_s25 = scalar_lea.vmem %s1623_s1, %s1331_s19  ;;  %1439 = vset.pattern.permute.xlu0 %v1483_v18 }
   0xf   : > { %v1440_v0 = vld [vmem:[%s250_s22 + $0x38] sm:$0xff]   ;;  %v1441_v1 = vld [vmem:[%s250_s22 + $0x30] sm:$0xff]   ;;  %v1442_v2 = vld [vmem:[%s250_s22 + $0x28] sm:$0xff]   ;;  %s1552_s29 = scalar_lea.vmem %s1624_s2, %s1333_s26  ;;  %1060 = vperm.xlu0 %1439, %v1056_v17   ;;  %s1334_s8 = sshll.u32 %s1632_s15, 4 }
  0x10   : > { %1360 = vmatprep.subr.bf16.mxu0 %v1440_v0  ;;  %v1443_v3 = vld [vmem:[%s250_s22 + $0x20] sm:$0xff]   ;;  %v1444_v5 = vld [vmem:[%s250_s22 + $0x18] sm:$0xff]   ;;  %v1445_v6 = vld [vmem:[%s250_s22 + $0x10] sm:$0xff]   ;;  %s268_s11 = scalar_lea.vmem %s1626_s4, %s1334_s8 }
  0x11   : > { %1361 = vmatpush3.bf16.msra.mxu0 %v1440_v0  ;;  %v1448_v4 = vld [vmem:[%s1536_s25] sm:$0xff]   ;;  %v1446_v7 = vld [vmem:[%s250_s22 + $0x8] sm:$0xff]   ;;  %v1450_v11 = vld [vmem:[%s1536_s25 + $0x10] sm:$0xff]  }
  0x12   : > { %1362 = vmatprep.subr.bf16.mxu0 %v1441_v1  ;;  %1376 = vmatprep.mubr.bf16.mxu0 %v1448_v4  ;;  %v1447_v8 = vld [vmem:[%s250_s22] sm:$0xff]   ;;  %v1449_v9 = vld [vmem:[%s1536_s25 + $0x8] sm:$0xff]   ;;  %v1451_v12 = vld [vmem:[%s1536_s25 + $0x18] sm:$0xff]  }
  0x13   : > { %v1452_v13 = vld [vmem:[%s1536_s25 + $0x20] sm:$0xff]   ;;  %v1453_v14 = vld [vmem:[%s1536_s25 + $0x28] sm:$0xff]   ;;  %v1454_v15 = vld [vmem:[%s1536_s25 + $0x30] sm:$0xff]   ;;  %1065 = vperm.xlu0 %1439, %v1057_v19  }
  0x14   : > { %v1455_v16 = vld [vmem:[%s1536_s25 + $0x38] sm:$0xff]  }
  0x15   : > { %1363 = vmatpush3.bf16.msra.mxu0 %v1441_v1 }
  0x16   : > { %1364 = vmatprep.subr.bf16.mxu0 %v1442_v2 }
  0x19   : > { %1365 = vmatpush3.bf16.msra.mxu0 %v1442_v2 }
  0x1a   : > { %1366 = vmatprep.subr.bf16.mxu0 %v1443_v3 }
  0x1d   : > { %1367 = vmatpush3.bf16.msra.mxu0 %v1443_v3 }
  0x1e   : > { %1368 = vmatprep.subr.bf16.mxu0 %v1444_v5 }
  0x21   : > { %1369 = vmatpush3.bf16.msra.mxu0 %v1444_v5 }
  0x22   : > { %1370 = vmatprep.subr.bf16.mxu0 %v1445_v6 }
  0x25   : > { %1371 = vmatpush3.bf16.msra.mxu0 %v1445_v6 }
  0x26   : > { %1372 = vmatprep.subr.bf16.mxu0 %v1446_v7 }
  0x29   : > { %1373 = vmatpush3.bf16.msra.mxu0 %v1446_v7 }
  0x2a   : > { %1374 = vmatprep.subr.bf16.mxu0 %v1447_v8 }
  0x2d   : > { %1375 = vmatpush3.bf16.msra.mxu0 %v1447_v8 }
  0x30   : > { %1377 = vmatmul.mubr.bf16.vlgmr.msra.gmra.mxu0 %v1449_v9 }
  0x31   : > { %1380 = vmatprep.mubr.bf16.mxu0 %v1450_v11 }
  0x38   : > { %1381 = vmatmul.mubr.bf16.gmra.mxu0 %v1451_v12 }
  0x39   : > { %1384 = vmatprep.mubr.bf16.mxu0 %v1452_v13 }
  0x40   : > { %1385 = vmatmul.mubr.bf16.gmra.mxu0 %v1453_v14 }
  0x41   : > { %1388 = vmatprep.mubr.bf16.mxu0 %v1454_v15 }
  0x48   : > { %1389 = vmatmul.mubr.bf16.gmra.mxu0 %v1455_v16 }
  0xf0   : > { %v1378_v20 = vpop.f32.mrf.mxu0 }
  0xf2   : > { %v1560_v21 = vpop.f32.mrf.mxu0 }
  0xf3   : > { %v545_v24 = vsel %vm544_vm1, %v1560_v21, -inf }
  0xf4   : > { %v1379_v22 = vpop.f32.mrf.mxu0 }
  0xf6   : > { %v435_v23 = vpop.f32.mrf.mxu0 }
  0xf7   : > { %v546_v25 = vsel %vm544_vm1, %v435_v23, -inf }
  0xf8   : > { %v573_v26 = vmax.f32 %v545_v24, %v546_v25 }
  0xfa   : > { %v576_v27 = vrot.slane %v573_v26, 4 }
  0xfc   : > { %v577_v28 = vmax.f32 %v573_v26, %v576_v27  ;;  %v1456_v26 = vld [vmem:[%s1552_s29] sm:$0xff]   ;;  %v1382_v27 = vpop.f32.mrf.mxu0 }
  0xfe   : > { %v578_v29 = vrot.slane %v577_v28, 2 }
 0x100   : > { %v579_v30 = vmax.f32 %v577_v28, %v578_v29  ;;  %v448_v28 = vpop.f32.mrf.mxu0 }
 0x102   : > { %v580_v31 = vrot.slane %v579_v30, 1  ;;  %v1383_v29 = vpop.f32.mrf.mxu0 }
 0x104   : > { %v581_v32 = vmax.f32 %v579_v30, %v580_v31  ;;  %v451_v30 = vpop.f32.mrf.mxu0 }
 0x106   : > { %vm582_vm2 = vcmp.eq.f32.partialorder %v1560_v21, %v581_v32  ;;  %vm583_vm3 = vcmp.eq.f32.partialorder %v435_v23, %v581_v32  ;;  %vm1208_vm9 = vcmp.eq.f32.partialorder %v581_v32, -inf  ;;  %v1386_v31 = vpop.f32.mrf.mxu0 }
 0x107   : > { %v646_v33 = vsel %vm582_vm2, -inf, %v1560_v21  ;;  %v647_v34 = vsel %vm583_vm3, -inf, %v435_v23  ;;  %v1223_v2 = vsel %vm583_vm3, 1.0, %v1481_v10  ;;  %v1224_v4 = vsel %vm1208_vm9, 1.0, %v1481_v10 }
 0x108   : > { %v662_v35 = vsel %vm544_vm1, %v646_v33, -inf  ;;  %v663_v36 = vsel %vm544_vm1, %v647_v34, -inf  ;;  %v1222_v11 = vsel %vm582_vm2, 1.0, %v1481_v10  ;;  %v464_v32 = vpop.f32.mrf.mxu0 }
 0x109   : > { %v690_v37 = vmax.f32 %v662_v35, %v663_v36 }
 0x10b   : > { %v693_v38 = vrot.slane %v690_v37, 4 }
 0x10d   : > { %v694_v39 = vmax.f32 %v690_v37, %v693_v38 }
 0x10f   : > { %v695_v40 = vrot.slane %v694_v39, 2 }
 0x111   : > { %v696_v41 = vmax.f32 %v694_v39, %v695_v40  ;;  %v1061_v39 = vpop.permute.xlu0 %1060 }
 0x113   : > { %v697_v42 = vrot.slane %v696_v41, 1 }
 0x115   : > { %v698_v43 = vmax.f32 %v696_v41, %v697_v42 }
 0x117   : > { %vm699_vm4 = vcmp.eq.f32.partialorder %v646_v33, %v698_v43  ;;  %vm700_vm5 = vcmp.eq.f32.partialorder %v647_v34, %v698_v43  ;;  %vm1238_vm8 = vcmp.eq.f32.partialorder %v698_v43, -inf }
 0x118   : > { %v763_v44 = vsel %vm699_vm4, -inf, %v646_v33  ;;  %v764_v45 = vsel %vm700_vm5, -inf, %v647_v34  ;;  %v1253_v63 = vsel %vm700_vm5, 1.0, %v1481_v10  ;;  %v1254_v0 = vsel %vm1238_vm8, 1.0, %v1481_v10  ;;  %v1387_v33 = vpop.f32.mrf.mxu0 }
 0x119   : > { %v779_v46 = vsel %vm544_vm1, %v763_v44, -inf  ;;  %v780_v47 = vsel %vm544_vm1, %v764_v45, -inf  ;;  %v1252_v3 = vsel %vm699_vm4, 1.0, %v1481_v10  ;;  %v748_v8 = vadd.f32 %v1253_v63, %v1223_v2 }
 0x11a   : > { %v807_v48 = vmax.f32 %v779_v46, %v780_v47  ;;  %v749_v9 = vadd.f32 %v1254_v0, %v1224_v4  ;;  %v747_v14 = vadd.f32 %v1252_v3, %v1222_v11  ;;  %v467_v34 = vpop.f32.mrf.mxu0 }
 0x11c   : > { %v810_v49 = vrot.slane %v807_v48, 4  ;;  %v1390_v35 = vpop.f32.mrf.mxu0 }
 0x11e   : > { %v811_v50 = vmax.f32 %v807_v48, %v810_v49  ;;  %v480_v36 = vpop.f32.mrf.mxu0 }
 0x120   : > { %v812_v51 = vrot.slane %v811_v50, 2  ;;  %v1391_v37 = vpop.f32.mrf.mxu0 }
 0x122   : > { %v813_v52 = vmax.f32 %v811_v50, %v812_v51  ;;  %v483_v38 = vpop.f32.mrf.mxu0 }
 0x124   : > { %v814_v53 = vrot.slane %v813_v52, 1 }
 0x126   : > { %v815_v54 = vmax.f32 %v813_v52, %v814_v53 }
 0x128   : > { %vm816_vm6 = vcmp.eq.f32.partialorder %v763_v44, %v815_v54  ;;  %vm817_vm7 = vcmp.eq.f32.partialorder %v764_v45, %v815_v54  ;;  %vm1268_vm10 = vcmp.eq.f32.partialorder %v815_v54, -inf }
 0x129   : > { %v880_v55 = vsel %vm816_vm6, -inf, %v763_v44  ;;  %v881_v56 = vsel %vm817_vm7, -inf, %v764_v45  ;;  %v1283_v5 = vsel %vm817_vm7, 1.0, %v1481_v10  ;;  %v1284_v6 = vsel %vm1268_vm10, 1.0, %v1481_v10  ;;  %v1066_v45 = vpop.permute.xlu0 %1065 }
 0x12a   : > { %v896_v57 = vsel %vm544_vm1, %v880_v55, -inf  ;;  %v897_v58 = vsel %vm544_vm1, %v881_v56, -inf  ;;  %v1282_v12 = vsel %vm816_vm6, 1.0, %v1481_v10  ;;  %v865_v15 = vadd.f32 %v1283_v5, %v748_v8 }
 0x12b   : > { %v924_v59 = vmax.f32 %v896_v57, %v897_v58  ;;  %v866_v16 = vadd.f32 %v1284_v6, %v749_v9  ;;  %v864_v17 = vadd.f32 %v1282_v12, %v747_v14 }
 0x12d   : > { %v927_v60 = vrot.slane %v924_v59, 4 }
 0x12f   : > { %v928_v61 = vmax.f32 %v924_v59, %v927_v60 }
 0x131   : > { %v929_v62 = vrot.slane %v928_v61, 2 }
 0x133   : > { %v930_v1 = vmax.f32 %v928_v61, %v929_v62 }
 0x135   : > { %v931_v7 = vrot.slane %v930_v1, 1 }
 0x137   : > { %v932_v13 = vmax.f32 %v930_v1, %v931_v7 }
 0x139   : > { %vm1298_vm11 = vcmp.eq.f32.partialorder %v932_v13, -inf  ;;  %vm933_vm12 = vcmp.eq.f32.partialorder %v880_v55, %v932_v13  ;;  %vm934_vm13 = vcmp.eq.f32.partialorder %v881_v56, %v932_v13 }
 0x13a   : > { %v1314_v18 = vsel %vm1298_vm11, 1.0, %v1481_v10  ;;  %v1312_v19 = vsel %vm933_vm12, 1.0, %v1481_v10  ;;  %v1313_v20 = vsel %vm934_vm13, 1.0, %v1481_v10 }
 0x13b   : > { %v983_v22 = vadd.f32 %v1314_v18, %v866_v16  ;;  %v981_v21 = vadd.f32 %v1312_v19, %v864_v17  ;;  %v982_v23 = vadd.f32 %v1313_v20, %v865_v15 }
 0x13d   : > { %v1000_v24 = vpack.c.bf16 %v983_v22, %v983_v22  ;;  %v999_v25 = vpack.c.bf16 %v982_v23, %v981_v21 }
 0x13f   : > { %1393 = vmatpush3.bf16.msra.mxu1 %v1000_v24 }
 0x140   : > { %1394 = vmatprep.subr.bf16.mxu1 %v1481_v10 }
 0x143   : > { %1395 = vmatpush3.bf16.msra.mxu1 %v1000_v24 }
 0x144   : > { %1396 = vmatprep.subr.bf16.mxu1 %v1481_v10 }
 0x147   : > { %1397 = vmatpush3.bf16.msra.mxu1 %v1000_v24 }
 0x148   : > { %1398 = vmatprep.subr.bf16.mxu1 %v1481_v10 }
 0x14b   : > { %1399 = vmatpush3.bf16.msra.mxu1 %v1000_v24 }
 0x14c   : > { %1400 = vmatprep.subr.bf16.mxu1 %v1481_v10 }
 0x14f   : > { %1401 = vmatpush3.bf16.msra.mxu1 %v1000_v24 }
 0x150   : > { %1402 = vmatprep.subr.bf16.mxu1 %v1481_v10 }
 0x153   : > { %1403 = vmatpush3.bf16.msra.mxu1 %v1000_v24 }
 0x154   : > { %1404 = vmatprep.subr.bf16.mxu1 %v1481_v10 }
 0x157   : > { %1405 = vmatpush3.bf16.msra.mxu1 %v1000_v24 }
 0x158   : > { %1406 = vmatprep.subr.bf16.mxu1 %v1481_v10 }
 0x15b   : > { %1407 = vmatpush3.bf16.msra.mxu1 %v999_v25 }
 0x15e   : > { %1409 = vmatmul.mubr.bf16.vlgmr.msra.gmra.mxu1 %v1456_v26 }
 0x21e   : > { %v1047_v40 = vpop.f32.mrf.mxu1 }
 0x21f   : > { %v1054_v10 = vmul.f32 0.25, %v1047_v40 }
 0x220   : > { %v1410_v41 = vpop.f32.mrf.mxu1 }
 0x221   : > { %v1068_v42 = vadd.f32 %v1061_v39, %v1054_v10 }
 0x222   : > { %v1050_v43 = vpop.f32.mrf.mxu1 }
 0x223   : > { %1070 = vst.msk [vmem:[%s268_s11] sm:$0xff] %vm544_vm1, %v1068_v42  ;;  %v1055_v44 = vmul.f32 0.25, %v1050_v43 }
 0x224   : > { %v1411_v46 = vpop.f32.mrf.mxu1 }
 0x225   : > { %v1069_v47 = vadd.f32 %v1066_v45, %v1055_v44 }
 0x227   : > { %1071 = vst.msk [vmem:[%s268_s11 + $0x8] sm:$0xff] %vm544_vm1, %v1069_v47 }
 0x228 PF: > { %s14_s17 = sadd.s32 1, %s1479_s17   ;;  %s1627_s15 = smov %s1475_s16 }
 0x229   : > { %p11_p5 = scmp.ge.s32.totalorder %s14_s17, 4   ;;  %s1628_s16 = smov %s1630_s18 }
 0x22b   :  { %13 = sbr.rel (!%p11_p5) target bundleno = 2 (0x2), region = 72 }

</bundles_post_ra>
